<compile_context>
chip_gen: v7x
topology: tpu7x:2x2x1
jax: 0.10.0
libtpu: 0.0.40
codegen_flags: <defaults>
</compile_context>

<pallas_src>
import functools

import jax
import jax.numpy as jnp
import numpy as np
from jax.experimental import pallas as pl
from jax.experimental.pallas import tpu as pltpu


# ----------------------------------------------------------------------------
# Packed-lane layout (layers 2 and 3 only; layer 1 uses row-split dots).
#   lanes [0, 64)   : policy branch   (hidden<=64, num_outputs<=64)
#   lanes [64, 128) : value branch    (hidden<=64, 1)
# Block-diagonal zero padding keeps the branches separated; tanh(0) == 0 keeps
# padded lanes at zero through the whole chain.
# ----------------------------------------------------------------------------
LANE = 128          # packed feature width (one vreg lane group)
BRANCH = 64         # per-branch lane budget
POL_OFF = 0         # policy branch lane offset
VAL_OFF = 64        # value branch lane offset
MAX_BATCH_TILE = 1024  # rows per grid step (upper bound)


def _round_up(x, m):
    return ((x + m - 1) // m) * m


def _choose_tile(B):
    """Pick batch tile tb (multiple of 8) and padded batch B_pad (multiple of tb).

    Scales the tile with B (step-overhead bound model) but keeps >=2 grid
    steps whenever possible so the "parallel" batch axis can shard across the
    two TensorCores on v7x.
    """
    B8 = _round_up(max(B, 1), 8)
    tb = min(MAX_BATCH_TILE, B8)
    if B8 // tb < 2 and B8 >= 16:        # keep >=2 grid steps for 2-TC chips
        tb = _round_up((B8 + 1) // 2, 8)
    B_pad = _round_up(B8, tb)
    return tb, B_pad


# ----------------------------------------------------------------------------
# Kernels: fused dual-branch 3-layer MLP on a (tb, *) batch tile.
# Output is the lane-packed (tb, 128) final layer.
# ----------------------------------------------------------------------------
def _mlp_tail(h1_pre, b1, w2, b2, w3, b3):
    h1 = jnp.tanh(h1_pre + b1)
    h2 = jnp.tanh(jnp.dot(h1, w2, preferred_element_type=jnp.float32) + b2)
    return jnp.dot(h2, w3, preferred_element_type=jnp.float32) + b3


def _dual_kernel(obs_ref, cobs_ref, w1p_ref, w1v_ref, b1_ref,
                 w2_ref, b2_ref, w3_ref, b3_ref, o_ref):
    # In-kernel "lane packing": x_packed @ W1  ==  obs @ W1p + cobs @ W1v
    pre = (jnp.dot(obs_ref[...], w1p_ref[...], preferred_element_type=jnp.float32)
           + jnp.dot(cobs_ref[...], w1v_ref[...], preferred_element_type=jnp.float32))
    o_ref[...] = _mlp_tail(pre, b1_ref[...], w2_ref[...], b2_ref[...],
                           w3_ref[...], b3_ref[...])


def _single_kernel(x_ref, w1_ref, b1_ref, w2_ref, b2_ref, w3_ref, b3_ref,
                   o_ref):
    pre = jnp.dot(x_ref[...], w1_ref[...], preferred_element_type=jnp.float32)
    o_ref[...] = _mlp_tail(pre, b1_ref[...], w2_ref[...], b2_ref[...],
                           w3_ref[...], b3_ref[...])


def _weight_specs(w1_shapes):
    """BlockSpecs for first-layer weight(s) + packed layers 2/3 (VMEM-resident)."""
    specs = [pl.BlockSpec(s, lambda i: (0, 0)) for s in w1_shapes]
    specs += [
        pl.BlockSpec((1, LANE), lambda i: (0, 0)),     # B1
        pl.BlockSpec((LANE, LANE), lambda i: (0, 0)),  # W2
        pl.BlockSpec((1, LANE), lambda i: (0, 0)),     # B2
        pl.BlockSpec((LANE, LANE), lambda i: (0, 0)),  # W3
        pl.BlockSpec((1, LANE), lambda i: (0, 0)),     # B3
    ]
    return specs


def _call_dual(packed, obs, cobs):
    B = obs.shape[0]
    tb, B_pad = _choose_tile(B)
    if B_pad != B:
        obs = jnp.pad(obs, ((0, B_pad - B), (0, 0)))
        cobs = jnp.pad(cobs, ((0, B_pad - B), (0, 0)))
    out = pl.pallas_call(
        _dual_kernel,
        out_shape=jax.ShapeDtypeStruct((B_pad, LANE), jnp.float32),
        grid=(B_pad // tb,),
        in_specs=[
            pl.BlockSpec((tb, obs.shape[1]), lambda i: (i, 0)),   # obs tile
            pl.BlockSpec((tb, cobs.shape[1]), lambda i: (i, 0)),  # cc_obs tile
        ] + _weight_specs([packed["W1p"].shape, packed["W1v"].shape]),
        out_specs=pl.BlockSpec((tb, LANE), lambda i: (i, 0)),
        compiler_params=pltpu.CompilerParams(
            dimension_semantics=("parallel",),   # shards across 2 TCs on v7x
        ),
    )(obs, cobs, packed["W1p"], packed["W1v"], packed["B1"],
      packed["W2"], packed["B2"], packed["W3"], packed["B3"])
    return out[:B]


def _call_single(w1, packed, x):
    B = x.shape[0]
    tb, B_pad = _choose_tile(B)
    if B_pad != B:
        x = jnp.pad(x, ((0, B_pad - B), (0, 0)))
    out = pl.pallas_call(
        _single_kernel,
        out_shape=jax.ShapeDtypeStruct((B_pad, LANE), jnp.float32),
        grid=(B_pad // tb,),
        in_specs=[
            pl.BlockSpec((tb, x.shape[1]), lambda i: (i, 0)),     # input tile
        ] + _weight_specs([w1.shape]),
        out_specs=pl.BlockSpec((tb, LANE), lambda i: (i, 0)),
        compiler_params=pltpu.CompilerParams(
            dimension_semantics=("parallel",),
        ),
    )(x, w1, packed["B1"], packed["W2"], packed["B2"],
      packed["W3"], packed["B3"])
    return out[:B]


# ----------------------------------------------------------------------------
# Parameter construction (normc-style column-normalized init) + lane packing.
# ----------------------------------------------------------------------------
def _normc_init(key, in_size, out_size, std=1.0):
    w = jax.random.normal(key, (in_size, out_size), dtype=jnp.float32)
    w = w * std / jnp.sqrt(jnp.sum(jnp.square(w), axis=0, keepdims=True))
    return w


def make_params(key, obs_dim, cc_obs_dim, hiddens, num_outputs):
    h1, h2 = hiddens
    assert max(h1, h2, num_outputs, 1) <= BRANCH, (
        "packed layout assumes hidden sizes / num_outputs fit in 64 lanes"
    )  # TODO(synk): widen the packed layout for larger fcnet configs.

    keys = jax.random.split(key, 6)
    raw = {
        # policy branch (_hidden_layers + _logits)
        "w1": _normc_init(keys[0], obs_dim, h1, 1.0),
        "b1": jnp.zeros((1, h1), jnp.float32),
        "w2": _normc_init(keys[1], h1, h2, 1.0),
        "b2": jnp.zeros((1, h2), jnp.float32),
        "w_logits": _normc_init(keys[2], h2, num_outputs, 0.01),
        "b_logits": jnp.zeros((1, num_outputs), jnp.float32),
        # centralized value branch (_value_branch_separate + _value_branch)
        "vw1": _normc_init(keys[3], cc_obs_dim, h1, 1.0),
        "vb1": jnp.zeros((1, h1), jnp.float32),
        "vw2": _normc_init(keys[4], h1, h2, 1.0),
        "vb2": jnp.zeros((1, h2), jnp.float32),
        "vw_out": _normc_init(keys[5], h2, 1, 1.0),
        "vb_out": jnp.zeros((1, 1), jnp.float32),
    }

    def first_layer(w, lane_off):
        W = jnp.zeros((w.shape[0], LANE), jnp.float32)
        return W.at[:, lane_off:lane_off + w.shape[1]].set(w)

    def block_diag(pol_w, val_w):
        W = jnp.zeros((LANE, LANE), jnp.float32)
        W = W.at[POL_OFF:POL_OFF + pol_w.shape[0],
                 POL_OFF:POL_OFF + pol_w.shape[1]].set(pol_w)
        W = W.at[VAL_OFF:VAL_OFF + val_w.shape[0],
                 VAL_OFF:VAL_OFF + val_w.shape[1]].set(val_w)
        return W

    def pack_bias(pol_b, val_b):
        b = jnp.zeros((1, LANE), jnp.float32)
        b = b.at[:, POL_OFF:POL_OFF + pol_b.shape[1]].set(pol_b)
        b = b.at[:, VAL_OFF:VAL_OFF + val_b.shape[1]].set(val_b)
        return b

    packed = {
        "W1p": first_layer(raw["w1"], POL_OFF),    # (obs_dim, 128)
        "W1v": first_layer(raw["vw1"], VAL_OFF),   # (cc_obs_dim, 128)
        "B1": pack_bias(raw["b1"], raw["vb1"]),
        "W2": block_diag(raw["w2"], raw["vw2"]),
        "B2": pack_bias(raw["b2"], raw["vb2"]),
        "W3": block_diag(raw["w_logits"], raw["vw_out"]),
        "B3": pack_bias(raw["b_logits"], raw["vb_out"]),
    }
    return {"raw": raw, "packed": packed,
            "obs_dim": obs_dim, "cc_obs_dim": cc_obs_dim,
            "num_outputs": num_outputs}


# ----------------------------------------------------------------------------
# Jitted implementations: pallas_call + all post-kernel slices in ONE jit so
# XLA fuses the slices with the kernel's consumers (no standalone slice ops).
# ----------------------------------------------------------------------------
@functools.partial(jax.jit, static_argnames=("num_outputs",))
def _forward_and_cv_impl(packed, obs, cc_obs, *, num_outputs):
    obs = obs.astype(jnp.float32).reshape(obs.shape[0], -1)
    cobs = cc_obs.astype(jnp.float32).reshape(cc_obs.shape[0], -1)
    out = _call_dual(packed, obs, cobs)
    logits = out[:, POL_OFF:POL_OFF + num_outputs]
    values = out[:, VAL_OFF]
    return logits, values


@functools.partial(jax.jit, static_argnames=("num_outputs",))
def _forward_impl(packed, obs, *, num_outputs):
    obs = obs.astype(jnp.float32).reshape(obs.shape[0], -1)
    out = _call_single(packed["W1p"], packed, obs)
    return out[:, POL_OFF:POL_OFF + num_outputs]


@jax.jit
def _central_value_impl(packed, cc_obs):
    cobs = cc_obs.astype(jnp.float32).reshape(cc_obs.shape[0], -1)
    out = _call_single(packed["W1v"], packed, cobs)
    return jnp.reshape(out[:, VAL_OFF], (-1,))


# ----------------------------------------------------------------------------
# Model-level wrappers mirroring the PyTorch module API.
# ----------------------------------------------------------------------------
def forward_and_central_value(params, obs_flat, cc_obs, state):
    """Hot path: both branches in ONE pallas_call. Returns (logits, state, v)."""
    logits, values = _forward_and_cv_impl(
        params["packed"], obs_flat, cc_obs, num_outputs=params["num_outputs"])
    return logits, state, values


def forward(params, obs_flat, state):
    """Equivalent to TorchCentralizedCriticModel.forward (policy branch only)."""
    logits = _forward_impl(params["packed"], obs_flat,
                           num_outputs=params["num_outputs"])
    return logits, state


def central_value_function(params, cc_obs):
    """Equivalent to TorchCentralizedCriticModel.central_value_function."""
    return _central_value_impl(params["packed"], cc_obs)


def value_function():
    """Equivalent to TorchCentralizedCriticModel.value_function."""
    return jnp.zeros((1,), jnp.float32)


# ----------------------------------------------------------------------------
# Pure-JAX reference for correctness checking.
# ----------------------------------------------------------------------------
def _mlp3_ref(x, w1, b1, w2, b2, w3, b3):
    h1 = jnp.tanh(x @ w1 + b1)
    h2 = jnp.tanh(h1 @ w2 + b2)
    return h2 @ w3 + b3


if __name__ == "__main__":
    # Small, deterministic shapes consistent with the module.
    B = 64            # batch
    OBS_DIM = 16      # flattened obs dim
    CC_OBS_DIM = 24   # centralized_critic_obs_dim
    HIDDENS = [32, 32]
    NUM_OUTPUTS = 4

    key = jax.random.PRNGKey(0)
    k_params, k_obs, k_cobs = jax.random.split(key, 3)

    params = make_params(k_params, OBS_DIM, CC_OBS_DIM, HIDDENS, NUM_OUTPUTS)
    obs = jax.random.normal(k_obs, (B, OBS_DIM), dtype=jnp.float32)
    cc_obs = jax.random.normal(k_cobs, (B, CC_OBS_DIM), dtype=jnp.float32)

    # Fused path: one pallas_call for both branches.
    logits, state, values = forward_and_central_value(params, obs, cc_obs,
                                                      state=[])
    logits = jax.block_until_ready(logits)
    values = jax.block_until_ready(values)
    assert logits.shape == (B, NUM_OUTPUTS)
    assert values.shape == (B,)

    # Individual-API wrappers (each a single pallas_call as well).
    logits2, _ = forward(params, obs, state=[])
    values2 = central_value_function(params, cc_obs)
    logits2 = jax.block_until_ready(logits2)
    values2 = jax.block_until_ready(values2)

    # Trivial value_function().
    vf = jax.block_until_ready(value_function())
    assert vf.shape == (1,)

    # Check against pure-JAX reference built from the raw (unpacked) weights.
    raw = params["raw"]
    logits_ref = _mlp3_ref(obs, raw["w1"], raw["b1"], raw["w2"], raw["b2"],
                           raw["w_logits"], raw["b_logits"])
    values_ref = _mlp3_ref(cc_obs, raw["vw1"], raw["vb1"], raw["vw2"],
                           raw["vb2"], raw["vw_out"], raw["vb_out"]).reshape(-1)

    np.testing.assert_allclose(np.asarray(logits), np.asarray(logits_ref),
                               rtol=1e-4, atol=1e-4)
    np.testing.assert_allclose(np.asarray(values), np.asarray(values_ref),
                               rtol=1e-4, atol=1e-4)
    np.testing.assert_allclose(np.asarray(logits2), np.asarray(logits_ref),
                               rtol=1e-4, atol=1e-4)
    np.testing.assert_allclose(np.asarray(values2), np.asarray(values_ref),
                               rtol=1e-4, atol=1e-4)

    # Exercise the batch-padding path (B not a multiple of 8 / of the tile).
    B_odd = 20
    obs_o = jax.random.normal(jax.random.PRNGKey(1), (B_odd, OBS_DIM),
                              dtype=jnp.float32)
    cc_o = jax.random.normal(jax.random.PRNGKey(2), (B_odd, CC_OBS_DIM),
                             dtype=jnp.float32)
    lo, _, vo = forward_and_central_value(params, obs_o, cc_o, state=[])
    lo = jax.block_until_ready(lo)
    vo = jax.block_until_ready(vo)
    lo_ref = _mlp3_ref(obs_o, raw["w1"], raw["b1"], raw["w2"], raw["b2"],
                       raw["w_logits"], raw["b_logits"])
    vo_ref = _mlp3_ref(cc_o, raw["vw1"], raw["vb1"], raw["vw2"], raw["vb2"],
                       raw["vw_out"], raw["vb_out"]).reshape(-1)
    np.testing.assert_allclose(np.asarray(lo), np.asarray(lo_ref),
                               rtol=1e-4, atol=1e-4)
    np.testing.assert_allclose(np.asarray(vo), np.asarray(vo_ref),
                               rtol=1e-4, atol=1e-4)

    print("KERNEL_OK")
</pallas_src>

<mosaic_0001>
module attributes {stable_mosaic.version = 11 : i64} {
  func.func @_dual_kernel(%arg0: i32, %arg1: memref<32x16xf32, #tpu.memory_space<vmem>>, %arg2: memref<32x24xf32, #tpu.memory_space<vmem>>, %arg3: memref<16x128xf32, #tpu.memory_space<vmem>>, %arg4: memref<24x128xf32, #tpu.memory_space<vmem>>, %arg5: memref<1x128xf32, #tpu.memory_space<vmem>>, %arg6: memref<128x128xf32, #tpu.memory_space<vmem>>, %arg7: memref<1x128xf32, #tpu.memory_space<vmem>>, %arg8: memref<128x128xf32, #tpu.memory_space<vmem>>, %arg9: memref<1x128xf32, #tpu.memory_space<vmem>>, %arg10: memref<32x128xf32, #tpu.memory_space<vmem>>) attributes {dimension_semantics = [#tpu.dimension_semantics<parallel>], iteration_bounds = array<i64: 2>, scalar_prefetch = 0 : i64, scratch_operands = 0 : i64, tpu.core_type = #tpu.core_type<tc>, window_params = [{transform_indices = @transform_0, window_bounds = array<i64: 32, 16>}, {transform_indices = @transform_1, window_bounds = array<i64: 32, 24>}, {pipeline_mode = #tpu.pipeline_mode<synchronous>, transform_indices = @transform_2, window_bounds = array<i64: 16, 128>}, {pipeline_mode = #tpu.pipeline_mode<synchronous>, transform_indices = @transform_3, window_bounds = array<i64: 24, 128>}, {pipeline_mode = #tpu.pipeline_mode<synchronous>, transform_indices = @transform_4, window_bounds = array<i64: 1, 128>}, {pipeline_mode = #tpu.pipeline_mode<synchronous>, transform_indices = @transform_5, window_bounds = array<i64: 128, 128>}, {pipeline_mode = #tpu.pipeline_mode<synchronous>, transform_indices = @transform_6, window_bounds = array<i64: 1, 128>}, {pipeline_mode = #tpu.pipeline_mode<synchronous>, transform_indices = @transform_7, window_bounds = array<i64: 128, 128>}, {pipeline_mode = #tpu.pipeline_mode<synchronous>, transform_indices = @transform_8, window_bounds = array<i64: 1, 128>}, {transform_indices = @transform_9, window_bounds = array<i64: 32, 128>}]} {
    %c0 = arith.constant 0 : index
    %c0_0 = arith.constant 0 : index
    %0 = vector.load %arg1[%c0, %c0_0] : memref<32x16xf32, #tpu.memory_space<vmem>>, vector<32x16xf32>
    %c0_1 = arith.constant 0 : index
    %c0_2 = arith.constant 0 : index
    %1 = vector.load %arg3[%c0_1, %c0_2] : memref<16x128xf32, #tpu.memory_space<vmem>>, vector<16x128xf32>
    %cst = arith.constant dense<0.000000e+00> : vector<32x128xf32>
    %2 = tpu.matmul %0, %1, %cst {dimension_numbers = #tpu.dot_dimension_numbers<[1], [0], [0], [1], [0, 0, 1, 1], [], []>} : vector<32x16xf32>, vector<16x128xf32>, vector<32x128xf32> -> vector<32x128xf32>
    %c0_3 = arith.constant 0 : index
    %c0_4 = arith.constant 0 : index
    %3 = vector.load %arg2[%c0_3, %c0_4] : memref<32x24xf32, #tpu.memory_space<vmem>>, vector<32x24xf32>
    %c0_5 = arith.constant 0 : index
    %c0_6 = arith.constant 0 : index
    %4 = vector.load %arg4[%c0_5, %c0_6] : memref<24x128xf32, #tpu.memory_space<vmem>>, vector<24x128xf32>
    %cst_7 = arith.constant dense<0.000000e+00> : vector<32x128xf32>
    %5 = tpu.matmul %3, %4, %cst_7 {dimension_numbers = #tpu.dot_dimension_numbers<[1], [0], [0], [1], [0, 0, 1, 1], [], []>} : vector<32x24xf32>, vector<24x128xf32>, vector<32x128xf32> -> vector<32x128xf32>
    %6 = arith.addf %2, %5 : vector<32x128xf32>
    %c0_8 = arith.constant 0 : index
    %c0_9 = arith.constant 0 : index
    %7 = vector.load %arg5[%c0_8, %c0_9] : memref<1x128xf32, #tpu.memory_space<vmem>>, vector<1x128xf32>
    %c0_10 = arith.constant 0 : index
    %c0_11 = arith.constant 0 : index
    %8 = vector.load %arg6[%c0_10, %c0_11] : memref<128x128xf32, #tpu.memory_space<vmem>>, vector<128x128xf32>
    %c0_12 = arith.constant 0 : index
    %c0_13 = arith.constant 0 : index
    %9 = vector.load %arg7[%c0_12, %c0_13] : memref<1x128xf32, #tpu.memory_space<vmem>>, vector<1x128xf32>
    %c0_14 = arith.constant 0 : index
    %c0_15 = arith.constant 0 : index
    %10 = vector.load %arg8[%c0_14, %c0_15] : memref<128x128xf32, #tpu.memory_space<vmem>>, vector<128x128xf32>
    %c0_16 = arith.constant 0 : index
    %c0_17 = arith.constant 0 : index
    %11 = vector.load %arg9[%c0_16, %c0_17] : memref<1x128xf32, #tpu.memory_space<vmem>>, vector<1x128xf32>
    %12 = vector.broadcast %7 : vector<1x128xf32> to vector<32x128xf32>
    %13 = arith.addf %6, %12 : vector<32x128xf32>
    %14 = math.tanh %13 : vector<32x128xf32>
    %cst_18 = arith.constant dense<0.000000e+00> : vector<32x128xf32>
    %15 = tpu.matmul %14, %8, %cst_18 {dimension_numbers = #tpu.dot_dimension_numbers<[1], [0], [0], [1], [0, 0, 1, 1], [], []>} : vector<32x128xf32>, vector<128x128xf32>, vector<32x128xf32> -> vector<32x128xf32>
    %16 = vector.broadcast %9 : vector<1x128xf32> to vector<32x128xf32>
    %17 = arith.addf %15, %16 : vector<32x128xf32>
    %18 = math.tanh %17 : vector<32x128xf32>
    %cst_19 = arith.constant dense<0.000000e+00> : vector<32x128xf32>
    %19 = tpu.matmul %18, %10, %cst_19 {dimension_numbers = #tpu.dot_dimension_numbers<[1], [0], [0], [1], [0, 0, 1, 1], [], []>} : vector<32x128xf32>, vector<128x128xf32>, vector<32x128xf32> -> vector<32x128xf32>
    %20 = vector.broadcast %11 : vector<1x128xf32> to vector<32x128xf32>
    %21 = arith.addf %19, %20 : vector<32x128xf32>
    %c0_20 = arith.constant 0 : index
    %c0_21 = arith.constant 0 : index
    %22 = vector.load %arg10[%c0_20, %c0_21] : memref<32x128xf32, #tpu.memory_space<vmem>>, vector<32x128xf32>
    tpu.vector_store %arg10[%c0_20, %c0_21], %21 {strides = array<i32>} : memref<32x128xf32, #tpu.memory_space<vmem>>, vector<32x128xf32>,
    return
  }
  func.func @transform_0(%arg0: i32) -> (i32, i32) {
    %c0_i32 = arith.constant 0 : i32
    %c0_i32_0 = arith.constant 0 : i32
    return %arg0, %c0_i32 : i32, i32
  }
  func.func @transform_1(%arg0: i32) -> (i32, i32) {
    %c0_i32 = arith.constant 0 : i32
    %c0_i32_0 = arith.constant 0 : i32
    return %arg0, %c0_i32 : i32, i32
  }
  func.func @transform_2(%arg0: i32) -> (i32, i32) {
    %c0_i32 = arith.constant 0 : i32
    %c0_i32_0 = arith.constant 0 : i32
    %c0_i32_1 = arith.constant 0 : i32
    return %c0_i32, %c0_i32_0 : i32, i32
  }
  func.func @transform_3(%arg0: i32) -> (i32, i32) {
    %c0_i32 = arith.constant 0 : i32
    %c0_i32_0 = arith.constant 0 : i32
    %c0_i32_1 = arith.constant 0 : i32
    return %c0_i32, %c0_i32_0 : i32, i32
  }
  func.func @transform_4(%arg0: i32) -> (i32, i32) {
    %c0_i32 = arith.constant 0 : i32
    %c0_i32_0 = arith.constant 0 : i32
    %c0_i32_1 = arith.constant 0 : i32
    return %c0_i32, %c0_i32_0 : i32, i32
  }
  func.func @transform_5(%arg0: i32) -> (i32, i32) {
    %c0_i32 = arith.constant 0 : i32
    %c0_i32_0 = arith.constant 0 : i32
    %c0_i32_1 = arith.constant 0 : i32
    return %c0_i32, %c0_i32_0 : i32, i32
  }
  func.func @transform_6(%arg0: i32) -> (i32, i32) {
    %c0_i32 = arith.constant 0 : i32
    %c0_i32_0 = arith.constant 0 : i32
    %c0_i32_1 = arith.constant 0 : i32
    return %c0_i32, %c0_i32_0 : i32, i32
  }
  func.func @transform_7(%arg0: i32) -> (i32, i32) {
    %c0_i32 = arith.constant 0 : i32
    %c0_i32_0 = arith.constant 0 : i32
    %c0_i32_1 = arith.constant 0 : i32
    return %c0_i32, %c0_i32_0 : i32, i32
  }
  func.func @transform_8(%arg0: i32) -> (i32, i32) {
    %c0_i32 = arith.constant 0 : i32
    %c0_i32_0 = arith.constant 0 : i32
    %c0_i32_1 = arith.constant 0 : i32
    return %c0_i32, %c0_i32_0 : i32, i32
  }
  func.func @transform_9(%arg0: i32) -> (i32, i32) {
    %c0_i32 = arith.constant 0 : i32
    %c0_i32_0 = arith.constant 0 : i32
    return %arg0, %c0_i32 : i32, i32
  }
}

</mosaic_0001>

<bundles_post_ra>
// kernel: _forward_and_cv_impl.1
= control target key start
LH: loop header
LB: loop body
LE: loop exit
PB: predicated region body
PF: predicated region fallthrough
CT: control target
= control target key end

     0   :  { %14 = vsyncpa [#allocation3], 0  ;;  %s1629_s0 = inlined_call_operand.vmem [shape: f32[64,16], index: 0, kind: input, shape index: {}]   ;;  %s1630_s1 = inlined_call_operand.vmem [shape: f32[64,24], index: 1, kind: input, shape index: {}]   ;;  %s1631_s2 = inlined_call_operand.hbm [shape: f32[16,128], index: 2, kind: input, shape index: {}]   ;;  %s1632_s3 = inlined_call_operand.vmem [shape: f32[24,128], index: 3, kind: input, shape index: {}]   ;;  %s1633_s4 = inlined_call_operand.vmem [shape: f32[1,128], index: 4, kind: input, shape index: {}]   ;;  %s1634_s5 = inlined_call_operand.vmem [shape: f32[128,128], index: 5, kind: input, shape index: {}]   ;;  %s1635_s6 = inlined_call_operand.vmem [shape: f32[1,128], index: 6, kind: input, shape index: {}]   ;;  %s1636_s7 = inlined_call_operand.hbm [shape: f32[128,128], index: 7, kind: input, shape index: {}]   ;;  %s1637_s8 = inlined_call_operand.hbm [shape: f32[1,128], index: 8, kind: input, shape index: {}]   ;;  %s1638_s9 = inlined_call_operand.vmem [shape: f32[64,128], index: 9, kind: output, shape index: {}]  }
   0x1   :  { %15 = vsyncpa [#allocation5], 0  ;;  %s1416_s30 = smov 0  }
   0x2 LB: > { %s947_s10 = sadd.s32 4294967295, %s1359_s30   ;;  %p949_p0 = scmp.ge.s32.totalorder %s1359_s30, 1  ;;  %s1359_s30 = sphi %s1416_s30, %s21_s30  }
   0x3   : > { %p251_p1 = scmp.lt.s32.totalorder %s1359_s30, 3  ;;  %p1426_p2 = scmp.eq.s32.totalorder %s947_s10, 0 }
   0x4   : > { %s1361_s13 = smov [#allocation4]   ;;  %s1362_s15 = smov [#allocation2]  }
   0x5   : > { %s1642_s11 = scalar_select %p1426_p2, 1, 0 }
   0x6   : > { %p1430_p3 = pnand %p949_p0, %p251_p1  ;;  %s288_s14 = sshll.u32 %s1361_s13, 4  ;;  %s289_s14 = int_to_ptr.vmem [resolvable:$true] %s288_s14 }
   0x7   : > { %s263_s16 = sshll.u32 %s1362_s15, 4  ;;  %s1363_s18 = smov [#allocation6]   ;;  %s1442_s16 = int_to_ptr.vmem [resolvable:$true] %s263_s16 }
   0x8   : > { %s1643_s12 = scalar_select %p1430_p3, 1, 0 }
   0x9   : > { %p1216_p4 = pneg %p1430_p3  ;;  %s302_s19 = sshll.u32 %s1363_s18, 4  ;;  %s1444_s19 = int_to_ptr.vmem [resolvable:$true] %s302_s19 }
   0xa   : > { %s1261_s22 = scalar_lea.hbm %s1636_s7, 2048 }
   0xb   : > { %p1438_p5 = pnand %p1426_p2, %p1216_p4  ;;  %p1262_p6 = scmp.ne.s32.totalorder %s1636_s7, %s1261_s22 }
   0xc   : > { %p1268_p10 = scmp.lt.u32.totalorder %s1261_s22, %s1636_s7 }
   0xd   : > { %p1454_p7 = pneg %p1438_p5 }
   0xf   : > { %p1264_p8 = pnand %p1454_p7, %p1262_p6 }
  0x11   : > { %p1265_p9 = pneg %p1264_p8 }
  0x13   : > { %p1270_p11 = pnand %p1268_p10, %p1265_p9 }
  0x15   : > { %1273 = shalt.err (!%p1270_p11)
}
  0x16   : > { %s1274_s28 = scalar_lea.vmem %s289_s14, 2048  ;;  %p1282_p1 = scmp.lt.s32.totalorder %s289_s14, %s289_s14 }
  0x17   : > { %p1275_p12 = scmp.ne.s32.totalorder %s289_s14, %s1274_s28  ;;  %p1283_p4 = scmp.lt.s32.totalorder %s1274_s28, %s1274_s28 }
  0x19   : > { %p1277_p13 = pnand %p1275_p12, %p1454_p7  ;;  %p1284_p2 = por %p1283_p4, %p1282_p1 }
  0x1b   : > { %p1278_p0 = pneg %p1277_p13 }
  0x1d   : > { %p1285_p3 = pnand %p1284_p2, %p1278_p0 }
  0x1f   : > { %1288 = shalt.err (!%p1285_p3)
}
  0x20   : > { %s1364_s29 = smov 128   ;;  %s1365_s13 = smov 8  }
  0x21   : > { %1222 = dma.hbm_to_vmem [thread:$0]  (!%p1438_p5), %s1636_s7, 2048, %s289_s14, [#allocation5], %s1364_s29, %s1364_s29, %s1365_s13  }
  0x22   : > { %s1289_s22 = scalar_lea.hbm %s1631_s2, 256 }
  0x23   : > { %p1290_p6 = scmp.ne.s32.totalorder %s1631_s2, %s1289_s22  ;;  %p1296_p8 = scmp.lt.u32.totalorder %s1289_s22, %s1631_s2 }
  0x25   : > { %p1292_p2 = pnand %p1290_p6, %p1454_p7 }
  0x27   : > { %p1293_p3 = pneg %p1292_p2 }
  0x29   : > { %p1298_p9 = pnand %p1296_p8, %p1293_p3 }
  0x2b   : > { %1301 = shalt.err (!%p1298_p9)
}
  0x2c   : > { %s1302_s14 = scalar_lea.vmem %s1442_s16, 256  ;;  %p1310_p13 = scmp.lt.s32.totalorder %s1442_s16, %s1442_s16 }
  0x2d   : > { %p1303_p10 = scmp.ne.s32.totalorder %s1442_s16, %s1302_s14  ;;  %p1311_p0 = scmp.lt.s32.totalorder %s1302_s14, %s1302_s14 }
  0x2f   : > { %p1305_p11 = pnand %p1303_p10, %p1454_p7  ;;  %p1312_p1 = por %p1311_p0, %p1310_p13 }
  0x31   : > { %p1306_p12 = pneg %p1305_p11 }
  0x33   : > { %p1313_p4 = pnand %p1312_p1, %p1306_p12 }
  0x35   : > { %1316 = shalt.err (!%p1313_p4)
}
  0x36   : > { %1219 = dma.hbm_to_vmem [thread:$0]  (!%p1438_p5), %s1631_s2, 256, %s1442_s16, [#allocation3], %s1364_s29, %s1364_s29, %s1365_s13  }
  0x37   : > { %s1317_s21 = scalar_lea.hbm %s1637_s8, 16 }
  0x38   : > { %p1318_p6 = scmp.ne.s32.totalorder %s1637_s8, %s1317_s21  ;;  %p1324_p8 = scmp.lt.u32.totalorder %s1317_s21, %s1637_s8 }
  0x3a   : > { %p1320_p2 = pnand %p1318_p6, %p1454_p7 }
  0x3c   : > { %p1321_p3 = pneg %p1320_p2 }
  0x3e   : > { %p1326_p9 = pnand %p1324_p8, %p1321_p3 }
  0x40   : > { %1329 = shalt.err (!%p1326_p9)
}
  0x41   : > { %s1330_s16 = scalar_lea.vmem %s1444_s19, 16  ;;  %s1337_s29 = scalar_lea.vmem %s1444_s19, 32 }
  0x42   : > { %p1331_p10 = scmp.ne.s32.totalorder %s1444_s19, %s1330_s16  ;;  %p1338_p13 = scmp.lt.s32.totalorder %s1444_s19, %s1444_s19 }
  0x43   : > { %p1339_p0 = scmp.lt.s32.totalorder %s1337_s29, %s1330_s16 }
  0x44   : > { %p1333_p11 = pnand %p1331_p10, %p1454_p7 }
  0x45   : > { %p1340_p1 = por %p1339_p0, %p1338_p13 }
  0x46   : > { %p1334_p12 = pneg %p1333_p11 }
  0x48   : > { %p1341_p4 = pnand %p1340_p1, %p1334_p12 }
  0x4a   : > { %1344 = shalt.err (!%p1341_p4)
}
  0x4b   : > { %1225 = dma.hbm_to_vmem [thread:$0]  (!%p1438_p5), %s1637_s8, 16, %s1444_s19, [#allocation5]  }
  0x4c   : > { %p1646_p6 = scmp.ne.s32.totalorder %s1643_s12, 0 }
  0x4d   : > { %p1647_p7 = scmp.ne.s32.totalorder (!%p1646_p6), %s1642_s11, 0 }
  0x4e   : > { %333 = sbr.rel (%p1646_p6) target bundleno = 774 (0x306), region = 56 }
  0x55   : > { %1350 = dma.done.wait (%p1647_p7), [#allocation3], 256  }
  0x56   : > { %1352 = vsyncadd (%p1647_p7), [#allocation3], 4294967040 }
  0x57   : > { %1354 = dma.done.wait (%p1647_p7), [#allocation5], 2064  }
  0x58   : > { %1356 = vsyncadd (%p1647_p7), [#allocation5], 4294965232  ;;  %s958_s17 = sshll.u32 %s947_s10, 2  ;;  %vm511_vm0 = vcmask 130048   ;;  %v410_v0 = vld [vmem:[%s1632_s3] sm:$0xff]  ;;  %v411_v1 = vld [vmem:[%s1632_s3 + $0x8] sm:$0xff] }
  0x59   : > { %p383_p2 = scmp.lt.s32.totalorder %s958_s17, 7  ;;  %v404_v2 = vld [vmem:[#allocation2] sm:$0xff]  ;;  %vm413_vm1 = vcmask 195584   ;;  %v1128_v3 = vpack.c.bf16 %v411_v1, %v410_v0  ;;  %v405_v4 = vld [vmem:[#allocation2 + $0x8] sm:$0xff]  ;;  %v412_v7 = vld [vmem:[%s1632_s3 + $0x10] sm:$0xff] }
  0x5a   : > { %v1132_v6 = vpack.c.bf16 %v405_v4, %v404_v2  ;;  %v610_v9 = vld [vmem:[%s1634_s5] sm:$0xff]  ;;  %v611_v10 = vld [vmem:[%s1634_s5 + $0x8] sm:$0xff]  ;;  %v612_v12 = vld [vmem:[%s1634_s5 + $0x10] sm:$0xff] }
  0x5b   : > { %s1649_s17 = smov (!%p383_p2, %s958_s17), 7  ;;  %1129 = vmatprep.subr.bf16.mxu1 %v1128_v3  ;;  %v613_v13 = vld [vmem:[%s1634_s5 + $0x18] sm:$0xff]  ;;  %v1136_v16 = vpack.c.bf16 %v611_v10, %v610_v9  ;;  %v614_v20 = vld [vmem:[%s1634_s5 + $0x20] sm:$0xff]  ;;  %v615_v21 = vld [vmem:[%s1634_s5 + $0x28] sm:$0xff] }
  0x5c   : > { %s1529_s19 = sshll.u32 %s1649_s17, 3  ;;  %1131 = vmatpush3.bf16.msra.mxu1 %v1128_v3  ;;  %1133 = vmatprep.subr.bf16.mxu0 %v1132_v6  ;;  %v1140_v18 = vpack.c.bf16 %v613_v13, %v612_v12  ;;  %v1144_v23 = vpack.c.bf16 %v615_v21, %v614_v20  ;;  %v616_v24 = vld [vmem:[%s1634_s5 + $0x30] sm:$0xff]  ;;  %v617_v25 = vld [vmem:[%s1634_s5 + $0x38] sm:$0xff]  ;;  %v618_v27 = vld [vmem:[%s1634_s5 + $0x40] sm:$0xff] }
  0x5d   : > { %s1535_s14 = scalar_lea.vmem %s1629_s0, %s1529_s19  ;;  %s1541_s11 = scalar_lea.vmem %s1630_s1, %s1529_s19  ;;  %1135 = vmatpush3.bf16.msra.mxu0 %v1132_v6  ;;  %1034 = vmatprep.subr.mxu1 %v412_v7  ;;  %v1148_v26 = vpack.c.bf16 %v617_v25, %v616_v24  ;;  %v619_v28 = vld [vmem:[%s1634_s5 + $0x48] sm:$0xff]  ;;  %v620_v30 = vld [vmem:[%s1634_s5 + $0x50] sm:$0xff]  ;;  %v621_v31 = vld [vmem:[%s1634_s5 + $0x58] sm:$0xff] }
  0x5e   : > { %v400_v5 = vld [vmem:[%s1535_s14] sm:$0xff]  ;;  %v401_v11 = vld [vmem:[%s1535_s14 + $0x8] sm:$0xff]  ;;  %v402_v15 = vld [vmem:[%s1535_s14 + $0x10] sm:$0xff]  ;;  %v1152_v29 = vpack.c.bf16 %v619_v28, %v618_v27  ;;  %v1156_v32 = vpack.c.bf16 %v621_v31, %v620_v30  ;;  %s398_s24 = scalar_lea.vmem %s1638_s9, %s1529_s19 }
  0x5f   : > { %1046 = vmatprep.mubr.msk.f32.mxu0 %vm511_vm0, %v400_v5  ;;  %v406_v8 = vld [vmem:[%s1541_s11] sm:$0xff]  ;;  %v407_v14 = vld [vmem:[%s1541_s11 + $0x8] sm:$0xff]  ;;  %v408_v17 = vld [vmem:[%s1541_s11 + $0x10] sm:$0xff] }
  0x60   : > { %1036 = vmatprep.mubr.msk.f32.mxu1 %vm413_vm1, %v406_v8  ;;  %1035 = vmatpush3.msra.mxu1 %v412_v7  ;;  %v403_v19 = vld [vmem:[%s1535_s14 + $0x18] sm:$0xff]  ;;  %v622_v33 = vld [vmem:[%s1634_s5 + $0x60] sm:$0xff]  ;;  %v623_v34 = vld [vmem:[%s1634_s5 + $0x68] sm:$0xff] }
  0x61   : > { %1047 = vmatmul.mubr.msk.f32.vlgmr.msra.gmra.mrb[0].mxu0 %vm511_vm0, %v401_v11  ;;  %1037 = vmatmul.mubr.msk.f32.vlgmr.msra.gmra.mrb[0].mxu1 %vm413_vm1, %v407_v14  ;;  %v409_v22 = vld [vmem:[%s1541_s11 + $0x18] sm:$0xff]  ;;  %v1160_v35 = vpack.c.bf16 %v623_v34, %v622_v33  ;;  %v624_v36 = vld [vmem:[%s1634_s5 + $0x70] sm:$0xff]  ;;  %v629_v41 = vld [vmem:[#allocation4 + $0x10] sm:$0xff] }
  0x62   : > { %1049 = vmatprep.mubr.msk.f32.mxu0 %vm511_vm0, %v402_v15  ;;  %1039 = vmatprep.mubr.msk.f32.mxu1 %vm413_vm1, %v408_v17  ;;  %v625_v37 = vld [vmem:[%s1634_s5 + $0x78] sm:$0xff]  ;;  %v627_v39 = vld [vmem:[#allocation4] sm:$0xff]  ;;  %v630_v43 = vld [vmem:[#allocation4 + $0x18] sm:$0xff] }
  0x63   : > { %1137 = vmatprep.subr.bf16.mxu1 %v1136_v16  ;;  %v1164_v38 = vpack.c.bf16 %v625_v37, %v624_v36  ;;  %v628_v40 = vld [vmem:[#allocation4 + $0x8] sm:$0xff]  ;;  %v1172_v44 = vpack.c.bf16 %v630_v43, %v629_v41  ;;  %v631_v45 = vld [vmem:[#allocation4 + $0x20] sm:$0xff]  ;;  %v633_v48 = vld [vmem:[#allocation4 + $0x30] sm:$0xff] }
  0x64   : > { %1139 = vmatpush3.bf16.msra.mxu1 %v1136_v16  ;;  %v1168_v42 = vpack.c.bf16 %v628_v40, %v627_v39  ;;  %v632_v46 = vld [vmem:[#allocation4 + $0x28] sm:$0xff]  ;;  %v634_v49 = vld [vmem:[#allocation4 + $0x38] sm:$0xff]  ;;  %v972_v53 = vld [vmem:[%s1633_s4] ss:$0 sm:$0xff] }
  0x65   : > { %1050 = vmatmul.mubr.msk.f32.gmra.mrb[2].mxu0 %vm511_vm0, %v403_v19  ;;  %1141 = vmatprep.subr.bf16.mxu1 %v1140_v18  ;;  %v1176_v47 = vpack.c.bf16 %v632_v46, %v631_v45  ;;  %v1180_v50 = vpack.c.bf16 %v634_v49, %v633_v48  ;;  %v635_v8 = vld [vmem:[#allocation4 + $0x40] sm:$0xff]  ;;  %v636_v9 = vld [vmem:[#allocation4 + $0x48] sm:$0xff]  ;;  %v637_v11 = vld [vmem:[#allocation4 + $0x50] sm:$0xff] }
  0x66   : > { %1040 = vmatmul.mubr.msk.f32.gmra.mrb[2].mxu1 %vm413_vm1, %v409_v22  ;;  %1169 = vmatprep.subr.bf16.mxu0 %v1168_v42  ;;  %v1184_v10 = vpack.c.bf16 %v636_v9, %v635_v8  ;;  %v638_v12 = vld [vmem:[#allocation4 + $0x58] sm:$0xff]  ;;  %v639_v14 = vld [vmem:[#allocation4 + $0x60] sm:$0xff]  ;;  %v640_v15 = vld [vmem:[#allocation4 + $0x68] sm:$0xff] }
  0x67   : > { %1171 = vmatpush3.bf16.msra.mxu0 %v1168_v42  ;;  %v1188_v13 = vpack.c.bf16 %v638_v12, %v637_v11  ;;  %v1192_v16 = vpack.c.bf16 %v640_v15, %v639_v14  ;;  %v641_v17 = vld [vmem:[#allocation4 + $0x70] sm:$0xff]  ;;  %v974_v33 = vld [vmem:[#allocation6] ss:$0 sm:$0xff] }
  0x68   : > { %1143 = vmatpush3.bf16.msra.mxu1 %v1140_v18  ;;  %1173 = vmatprep.subr.bf16.mxu0 %v1172_v44  ;;  %v642_v18 = vld [vmem:[#allocation4 + $0x78] sm:$0xff]  ;;  %v973_v20 = vld [vmem:[%s1635_s6] ss:$0 sm:$0xff] }
  0x69   : > { %1145 = vmatprep.subr.bf16.mxu1 %v1144_v23  ;;  %v1196_v19 = vpack.c.bf16 %v642_v18, %v641_v17 }
  0x6b   : > { %1175 = vmatpush3.bf16.msra.mxu0 %v1172_v44 }
  0x6c   : > { %1147 = vmatpush3.bf16.msra.mxu1 %v1144_v23  ;;  %1177 = vmatprep.subr.bf16.mxu0 %v1176_v47 }
  0x6d   : > { %1149 = vmatprep.subr.bf16.mxu1 %v1148_v26 }
  0x6f   : > { %1179 = vmatpush3.bf16.msra.mxu0 %v1176_v47 }
  0x70   : > { %1151 = vmatpush3.bf16.msra.mxu1 %v1148_v26  ;;  %1181 = vmatprep.subr.bf16.mxu0 %v1180_v50 }
  0x71   : > { %1153 = vmatprep.subr.bf16.mxu1 %v1152_v29 }
  0x73   : > { %1183 = vmatpush3.bf16.msra.mxu0 %v1180_v50 }
  0x74   : > { %1155 = vmatpush3.bf16.msra.mxu1 %v1152_v29  ;;  %1185 = vmatprep.subr.bf16.mxu0 %v1184_v10 }
  0x75   : > { %1157 = vmatprep.subr.bf16.mxu1 %v1156_v32 }
  0x77   : > { %1187 = vmatpush3.bf16.msra.mxu0 %v1184_v10 }
  0x78   : > { %1159 = vmatpush3.bf16.msra.mxu1 %v1156_v32  ;;  %1189 = vmatprep.subr.bf16.mxu0 %v1188_v13 }
  0x79   : > { %1161 = vmatprep.subr.bf16.mxu1 %v1160_v35 }
  0x7b   : > { %1191 = vmatpush3.bf16.msra.mxu0 %v1188_v13 }
  0x7c   : > { %1163 = vmatpush3.bf16.msra.mxu1 %v1160_v35  ;;  %1193 = vmatprep.subr.bf16.mxu0 %v1192_v16 }
  0x7d   : > { %1165 = vmatprep.subr.bf16.mxu1 %v1164_v38 }
  0x7f   : > { %1195 = vmatpush3.bf16.msra.mxu0 %v1192_v16 }
  0x80   : > { %1167 = vmatpush3.bf16.msra.mxu1 %v1164_v38  ;;  %1197 = vmatprep.subr.bf16.mxu0 %v1196_v19 }
  0x83   : > { %1199 = vmatpush3.bf16.msra.mxu0 %v1196_v19 }
 0x134   : > { %v1048_v51 = vpop.f32.mrb[0].mxu0  ;;  %v1038_v52 = vpop.f32.mrb[0].mxu1 }
 0x135   : > { %v590_v54 = vpop.f32.mrb[1].mxu0  ;;  %v596_v55 = vadd.f32 %v1048_v51, %v1038_v52  ;;  %v492_v56 = vpop.f32.mrb[1].mxu1 }
 0x136   : > { %v591_v57 = vadd.f32 %v590_v54, %v492_v56 }
 0x137   : > { %v651_v58 = vadd.f32 %v972_v53, %v596_v55 }
 0x138   : > { %v1051_v59 = vpop.f32.mrb[2].mxu0  ;;  %v650_v60 = vadd.f32 %v972_v53, %v591_v57 }
 0x139   : > { %v1041_v61 = vpop.f32.mrb[2].mxu1  ;;  %v600_v62 = vpop.f32.mrb[3].mxu0 }
 0x13a   : > { %v606_v63 = vadd.f32 %v1051_v59, %v1041_v61  ;;  %v502_v0 = vpop.f32.mrb[3].mxu1  ;;  %1245 = vtanh.f32 %v650_v60 }
 0x13b   : > { %v601_v1 = vadd.f32 %v600_v62, %v502_v0  ;;  %1247 = vtanh.f32 %v651_v58 }
 0x13c   : > { %v653_v2 = vadd.f32 %v972_v53, %v606_v63 }
 0x13d   : > { %v652_v3 = vadd.f32 %v972_v53, %v601_v1 }
 0x13f   : > { %1249 = vtanh.f32 %v652_v3 }
 0x140   : > { %1251 = vtanh.f32 %v653_v2 }
 0x144   : > { %v1246_v4 = vpop.eup %1245 }
 0x145   : > { %v1248_v5 = vpop.eup %1247  ;;  %1084 = vmatprep.mubr.f32.mxu1 %v1246_v4 }
 0x146   : > { %1085 = vmatmul.mubr.f32.vlgmr.msra.gmra.mrb[4].mxu1 %v1248_v5 }
 0x149   : > { %v1250_v6 = vpop.eup %1249 }
 0x14a   : > { %v1252_v7 = vpop.eup %1251  ;;  %1087 = vmatprep.mubr.f32.mxu1 %v1250_v6 }
 0x14b   : > { %1088 = vmatmul.mubr.f32.gmra.mrb[6].mxu1 %v1252_v7 }
 0x219   : > { %v1086_v21 = vpop.f32.mrb[4].mxu1 }
 0x21a   : > { %v736_v22 = vadd.f32 %v1086_v21, %v973_v20  ;;  %v730_v23 = vpop.f32.mrb[5].mxu1 }
 0x21b   : > { %v731_v24 = vadd.f32 %v973_v20, %v730_v23 }
 0x21d   : > { %1253 = vtanh.f32 %v731_v24 }
 0x21e   : > { %v1089_v25 = vpop.f32.mrb[6].mxu1  ;;  %1255 = vtanh.f32 %v736_v22 }
 0x21f   : > { %v746_v26 = vadd.f32 %v1089_v25, %v973_v20  ;;  %v740_v27 = vpop.f32.mrb[7].mxu1 }
 0x220   : > { %v741_v28 = vadd.f32 %v973_v20, %v740_v27 }
 0x222   : > { %1257 = vtanh.f32 %v741_v28 }
 0x223   : > { %1259 = vtanh.f32 %v746_v26 }
 0x227   : > { %v1254_v29 = vpop.eup %1253 }
 0x228   : > { %v1256_v30 = vpop.eup %1255  ;;  %1122 = vmatprep.mubr.f32.mxu0 %v1254_v29 }
 0x229   : > { %1123 = vmatmul.mubr.f32.vlgmr.msra.gmra.mrb[4].mxu0 %v1256_v30 }
 0x22c   : > { %v1258_v31 = vpop.eup %1257 }
 0x22d   : > { %v1260_v32 = vpop.eup %1259  ;;  %1125 = vmatprep.mubr.f32.mxu0 %v1258_v31 }
 0x22e   : > { %1126 = vmatmul.mubr.f32.gmra.mrb[6].mxu0 %v1260_v32 }
 0x2fc   : > { %v1124_v34 = vpop.f32.mrb[4].mxu0 }
 0x2fd   : > { %v825_v35 = vpop.f32.mrb[5].mxu0  ;;  %v831_v37 = vadd.f32 %v1124_v34, %v974_v33 }
 0x2fe   : > { %v826_v36 = vadd.f32 %v974_v33, %v825_v35 }
 0x2ff   : > { %845 = vst [vmem:[%s398_s24 + $0x8] sm:$0xff] %v831_v37 }
 0x300   : > { %844 = vst [vmem:[%s398_s24] sm:$0xff] %v826_v36 }
 0x301   : > { %v1127_v38 = vpop.f32.mrb[6].mxu0 }
 0x302   : > { %v835_v39 = vpop.f32.mrb[7].mxu0  ;;  %v841_v41 = vadd.f32 %v1127_v38, %v974_v33 }
 0x303   : > { %v836_v40 = vadd.f32 %v974_v33, %v835_v39 }
 0x304   : > { %847 = vst [vmem:[%s398_s24 + $0x18] sm:$0xff] %v841_v41 }
 0x305   : > { %846 = vst [vmem:[%s398_s24 + $0x10] sm:$0xff] %v836_v40 }
 0x306 PF: > { %s21_s30 = sadd.s32 1, %s1359_s30  }
 0x307   : > { %p18_p5 = scmp.ge.s32.totalorder %s21_s30, 4  }
 0x309   :  { %20 = sbr.rel (!%p18_p5) target bundleno = 2 (0x2), region = 102 }
 0x310   :  { %870 = vsyncpa [#allocation3], 1 }
 0x311   :  { %872 = vsyncpa [#allocation3 + $0x1], 1 }
 0x312   :  { %873 = vsyncpa [#allocation5], 1 }

</bundles_post_ra>
